<compile_context>
chip_gen: v6e
topology: v6e:2x2x1
jax: 0.10.0
libtpu: 0.0.40
codegen_flags: <defaults>
</compile_context>

<pallas_src>
import math

import jax
import jax.numpy as jnp
import numpy as np
from jax import lax
from jax.experimental import pallas as pl
from jax.experimental.pallas import tpu as pltpu

EPS = 1e-6  # LayerNormalization eps


def make_encoder_kernel(S, D, H, DFF, ff_chunk):
    dk = D // H
    n_ff_chunks = DFF // ff_chunk

    def kernel(ln_ref, x_ref,
               wqkv_ref, bqkv_ref, wo_ref, bo_ref,
               w1_ref, b1_ref, w2_ref, b2_ref,
               o_ref, attn_scr):
        x = x_ref[0]  # (S, D) f32 -- one batch element per grid step

        def layer_norm(v, alpha, bias):
            mean = jnp.mean(v, axis=-1, keepdims=True)
            # torch.std() is unbiased: divide by (N - 1)
            var = jnp.sum((v - mean) ** 2, axis=-1, keepdims=True) / (D - 1)
            std = jnp.sqrt(var)
            inv = pl.reciprocal(std + EPS, approx=True)  # EUP, off the VPU slot
            return alpha * (v - mean) * inv + bias

        # ---------------- residual connection 0: x + MHA(LN(x)) ----------------
        ln1 = layer_norm(x, ln_ref[0, 0], ln_ref[0, 1])
        ln1_bf = ln1.astype(jnp.bfloat16)

        # Fused QKV projection: one bf16 MXU matmul over ln1 instead of three.
        # (The Q slice of wqkv/bqkv already carries the 1/sqrt(dk) scale.)
        qkv = jnp.dot(ln1_bf, wqkv_ref[...],
                      preferred_element_type=jnp.float32) + bqkv_ref[...]  # (S, 3D)

        for h in range(H):  # static loop over heads (H is small)
            q_bf = qkv[:, h * dk:(h + 1) * dk].astype(jnp.bfloat16)
            k_bf = qkv[:, D + h * dk:D + (h + 1) * dk].astype(jnp.bfloat16)
            v_bf = qkv[:, 2 * D + h * dk:2 * D + (h + 1) * dk].astype(jnp.bfloat16)

            # scores = q @ k^T (contract dk on both; no explicit transpose)
            s = lax.dot_general(q_bf, k_bf,
                                dimension_numbers=(((1,), (1,)), ((), ())),
                                preferred_element_type=jnp.float32)  # (S, S) f32
            # NOTE: mask intentionally NOT applied -- see header comment.
            s = s - jnp.max(s, axis=-1, keepdims=True)
            p = jnp.exp(s)
            p = p * pl.reciprocal(jnp.sum(p, axis=-1, keepdims=True), approx=True)

            o_h = jnp.dot(p.astype(jnp.bfloat16), v_bf,
                          preferred_element_type=jnp.float32)        # (S, dk) f32
            # Write head output straight into the (S, D) f32 scratch (no concat).
            attn_scr[:, h * dk:(h + 1) * dk] = o_h

        attn = jnp.dot(attn_scr[...].astype(jnp.bfloat16), wo_ref[...],
                       preferred_element_type=jnp.float32) + bo_ref[...]
        x1 = x + attn  # residual in f32

        # ---------------- residual connection 1: x + FFN(LN(x)) ----------------
        ln2 = layer_norm(x1, ln_ref[1, 0], ln_ref[1, 1])
        ln2_bf = ln2.astype(jnp.bfloat16)

        acc = x1 + b2_ref[...]  # start from residual + final bias, accumulate chunks
        for c in range(n_ff_chunks):  # DFF-chunked: never materializes full (S, DFF)
            lo, hi = c * ff_chunk, (c + 1) * ff_chunk
            hdn = jnp.dot(ln2_bf, w1_ref[:, lo:hi],
                          preferred_element_type=jnp.float32) + b1_ref[:, lo:hi]
            hdn = jnp.maximum(hdn, 0.0).astype(jnp.bfloat16)          # ReLU
            acc = acc + jnp.dot(hdn, w2_ref[lo:hi, :],
                                preferred_element_type=jnp.float32)
        o_ref[0] = acc.astype(o_ref.dtype)

    return kernel


def encoder_block_forward(x, mask, params):
    """x: (B, S, D), mask: (B, S, S) (unused, see header). Returns (B, S, D)."""
    del mask
    B, S, D = x.shape
    H = params["n_heads"]
    DFF = params["w1"].shape[1]
    dk = D // H
    scale = 1.0 / math.sqrt(dk)

    # Host-side weight prep: fuse Q/K/V (with 1/sqrt(dk) folded into the Q slice)
    # and cast all MXU weights to bf16.
    wqkv = jnp.concatenate(
        [params["wq"] * scale, params["wk"], params["wv"]], axis=1
    ).astype(jnp.bfloat16)
    bqkv = jnp.concatenate(
        [params["bq"] * scale, params["bk"], params["bv"]], axis=1
    ).astype(jnp.float32)
    wo = params["wo"].astype(jnp.bfloat16)
    w1 = params["w1"].astype(jnp.bfloat16)
    w2 = params["w2"].astype(jnp.bfloat16)

    # FFN chunk size (caps the live hidden at realistic DFF; single chunk when small).
    ff_chunk = 512 if (DFF > 512 and DFF % 512 == 0) else DFF

    kernel = make_encoder_kernel(S, D, H, DFF, ff_chunk)

    def full(shape):
        # Constant-index weight blocks (resident across the whole grid).
        return pl.BlockSpec(shape, lambda b: (0,) * len(shape))

    grid_spec = pltpu.PrefetchScalarGridSpec(
        num_scalar_prefetch=0,
        grid=(B,),
        in_specs=[
            pl.BlockSpec(memory_space=pltpu.MemorySpace.SMEM),   # LN params (2, 2)
            pl.BlockSpec((1, S, D), lambda b: (b, 0, 0)),        # x
            full((D, 3 * D)), full((1, 3 * D)),                  # fused wqkv, bqkv
            full((D, D)), full((1, D)),                          # wo, bo
            full((D, DFF)), full((1, DFF)),                      # w1, b1
            full((DFF, D)), full((1, D)),                        # w2, b2
        ],
        out_specs=pl.BlockSpec((1, S, D), lambda b: (b, 0, 0)),
        scratch_shapes=[pltpu.VMEM((S, D), jnp.float32)],        # per-head output slab
    )

    return pl.pallas_call(
        kernel,
        out_shape=jax.ShapeDtypeStruct((B, S, D), x.dtype),
        grid_spec=grid_spec,
        compiler_params=pltpu.CompilerParams(
            dimension_semantics=("parallel",),
            vmem_limit_bytes=48 * 1024 * 1024,  # > default scoped limit, < v7x physical
        ),
    )(
        params["ln"], x,
        wqkv, bqkv, wo, params["bo"],
        w1, params["b1"], w2, params["b2"],
    )


def reference_forward(x, params):
    """Pure-JAX f32 reference of the same forward pass (for verification)."""
    B, S, D = x.shape
    H = params["n_heads"]
    dk = D // H

    def layer_norm(v, alpha, bias):
        mean = jnp.mean(v, axis=-1, keepdims=True)
        std = jnp.sqrt(jnp.sum((v - mean) ** 2, axis=-1, keepdims=True) / (D - 1))
        return alpha * (v - mean) / (std + EPS) + bias

    lin = lambda v, w, b: v @ w + b

    ln1 = layer_norm(x, params["ln"][0, 0], params["ln"][0, 1])
    q = lin(ln1, params["wq"], params["bq"]).reshape(B, S, H, dk).transpose(0, 2, 1, 3)
    k = lin(ln1, params["wk"], params["bk"]).reshape(B, S, H, dk).transpose(0, 2, 1, 3)
    v = lin(ln1, params["wv"], params["bv"]).reshape(B, S, H, dk).transpose(0, 2, 1, 3)
    s = jnp.einsum("bhqd,bhkd->bhqk", q, k) / math.sqrt(dk)
    p = jax.nn.softmax(s, axis=-1)
    o = jnp.einsum("bhqk,bhkd->bhqd", p, v).transpose(0, 2, 1, 3).reshape(B, S, D)
    x1 = x + lin(o, params["wo"], params["bo"])
    ln2 = layer_norm(x1, params["ln"][1, 0], params["ln"][1, 1])
    ff = lin(jnp.maximum(lin(ln2, params["w1"], params["b1"]), 0.0),
             params["w2"], params["b2"])
    return x1 + ff


if __name__ == "__main__":
    B, S, D, H, DFF = 2, 8, 32, 4, 64

    key = jax.random.PRNGKey(0)
    ks = jax.random.split(key, 14)

    def init_linear(kw, kb, din, dout):
        bound = 1.0 / math.sqrt(din)
        w = jax.random.uniform(kw, (din, dout), jnp.float32, -bound, bound)
        b = jax.random.uniform(kb, (1, dout), jnp.float32, -bound, bound)
        return w, b

    wq, bq = init_linear(ks[0], ks[1], D, D)
    wk, bk = init_linear(ks[2], ks[3], D, D)
    wv, bv = init_linear(ks[4], ks[5], D, D)
    wo, bo = init_linear(ks[6], ks[7], D, D)
    w1, b1 = init_linear(ks[8], ks[9], D, DFF)
    w2, b2 = init_linear(ks[10], ks[11], DFF, D)

    params = dict(
        n_heads=H,
        # LayerNormalization __init__: alpha = ones(1), bias = zeros(1)
        ln=jnp.array([[1.0, 0.0], [1.0, 0.0]], dtype=jnp.float32),
        wq=wq, bq=bq, wk=wk, bk=bk, wv=wv, bv=bv, wo=wo, bo=bo,
        w1=w1, b1=b1, w2=w2, b2=b2,
    )

    x = jax.random.normal(ks[12], (B, S, D), jnp.float32)
    mask = jnp.ones((B, S, S), jnp.float32)  # unused (matches PyTorch masked_fill bug)

    out = encoder_block_forward(x, mask, params)
    out = jax.block_until_ready(out)

    ref = jax.block_until_ready(reference_forward(x, params))
    # bf16 MXU inputs (f32 accumulation) => loosened tolerance vs f32 reference.
    np.testing.assert_allclose(np.asarray(out), np.asarray(ref),
                               rtol=5e-2, atol=5e-2)

    print("KERNEL_OK")
</pallas_src>

<mosaic_0001>
module attributes {stable_mosaic.version = 11 : i64} {
  func.func @kernel(%arg0: i32, %arg1: memref<2x2xf32, #tpu.memory_space<smem>>, %arg2: memref<1x8x32xf32, #tpu.memory_space<vmem>>, %arg3: memref<32x96xbf16, #tpu.memory_space<vmem>>, %arg4: memref<1x96xf32, #tpu.memory_space<vmem>>, %arg5: memref<32x32xbf16, #tpu.memory_space<vmem>>, %arg6: memref<1x32xf32, #tpu.memory_space<vmem>>, %arg7: memref<32x64xbf16, #tpu.memory_space<vmem>>, %arg8: memref<1x64xf32, #tpu.memory_space<vmem>>, %arg9: memref<64x32xbf16, #tpu.memory_space<vmem>>, %arg10: memref<1x32xf32, #tpu.memory_space<vmem>>, %arg11: memref<1x8x32xf32, #tpu.memory_space<vmem>>, %arg12: memref<8x32xf32, #tpu.memory_space<vmem>>) attributes {dimension_semantics = [#tpu.dimension_semantics<parallel>], iteration_bounds = array<i64: 2>, scalar_prefetch = 0 : i64, scratch_operands = 1 : i64, tpu.core_type = #tpu.core_type<tc>, window_params = [{transform_indices = @transform_0, window_bounds = array<i64: 2, 2>}, {transform_indices = @transform_1, window_bounds = array<i64: 1, 8, 32>}, {pipeline_mode = #tpu.pipeline_mode<synchronous>, transform_indices = @transform_2, window_bounds = array<i64: 32, 96>}, {pipeline_mode = #tpu.pipeline_mode<synchronous>, transform_indices = @transform_3, window_bounds = array<i64: 1, 96>}, {pipeline_mode = #tpu.pipeline_mode<synchronous>, transform_indices = @transform_4, window_bounds = array<i64: 32, 32>}, {pipeline_mode = #tpu.pipeline_mode<synchronous>, transform_indices = @transform_5, window_bounds = array<i64: 1, 32>}, {pipeline_mode = #tpu.pipeline_mode<synchronous>, transform_indices = @transform_6, window_bounds = array<i64: 32, 64>}, {pipeline_mode = #tpu.pipeline_mode<synchronous>, transform_indices = @transform_7, window_bounds = array<i64: 1, 64>}, {pipeline_mode = #tpu.pipeline_mode<synchronous>, transform_indices = @transform_8, window_bounds = array<i64: 64, 32>}, {pipeline_mode = #tpu.pipeline_mode<synchronous>, transform_indices = @transform_9, window_bounds = array<i64: 1, 32>}, {transform_indices = @transform_10, window_bounds = array<i64: 1, 8, 32>}]} {
    %c0 = arith.constant 0 : index
    %c0_0 = arith.constant 0 : index
    %c0_1 = arith.constant 0 : index
    %0 = vector.load %arg2[%c0, %c0_0, %c0_1] : memref<1x8x32xf32, #tpu.memory_space<vmem>>, vector<1x8x32xf32>
    %1 = vector.shape_cast %0 : vector<1x8x32xf32> to vector<8x32xf32>
    %c0_2 = arith.constant 0 : index
    %c0_3 = arith.constant 0 : index
    %2 = memref.load %arg1[%c0_2, %c0_3] : memref<2x2xf32, #tpu.memory_space<smem>>
    %c0_4 = arith.constant 0 : index
    %c1 = arith.constant 1 : index
    %3 = memref.load %arg1[%c0_4, %c1] : memref<2x2xf32, #tpu.memory_space<smem>>
    %cst = arith.constant dense<0.000000e+00> : vector<8xf32>
    %4 = vector.multi_reduction <add>, %1, %cst [1] : vector<8x32xf32> to vector<8xf32>
    %5 = vector.shape_cast %4 : vector<8xf32> to vector<8x1xf32>
    %cst_5 = arith.constant 3.200000e+01 : f32
    %6 = vector.broadcast %cst_5 : f32 to vector<8x1xf32>
    %7 = arith.divf %5, %6 : vector<8x1xf32>
    %8 = vector.broadcast %7 : vector<8x1xf32> to vector<8x32xf32>
    %9 = arith.subf %1, %8 : vector<8x32xf32>
    %10 = arith.mulf %9, %9 : vector<8x32xf32>
    %cst_6 = arith.constant dense<0.000000e+00> : vector<8xf32>
    %11 = vector.multi_reduction <add>, %10, %cst_6 [1] : vector<8x32xf32> to vector<8xf32>
    %12 = vector.shape_cast %11 : vector<8xf32> to vector<8x1xf32>
    %cst_7 = arith.constant 3.100000e+01 : f32
    %13 = vector.broadcast %cst_7 : f32 to vector<8x1xf32>
    %14 = arith.divf %12, %13 : vector<8x1xf32>
    %15 = math.sqrt %14 : vector<8x1xf32>
    %cst_8 = arith.constant 9.99999997E-7 : f32
    %16 = vector.broadcast %cst_8 : f32 to vector<8x1xf32>
    %17 = arith.addf %15, %16 : vector<8x1xf32>
    %18 = tpu.reciprocal %17 {approx = true} : vector<8x1xf32> -> vector<8x1xf32>
    %19 = vector.broadcast %7 : vector<8x1xf32> to vector<8x32xf32>
    %20 = arith.subf %1, %19 : vector<8x32xf32>
    %21 = vector.broadcast %2 : f32 to vector<8x32xf32>
    %22 = arith.mulf %21, %20 : vector<8x32xf32>
    %23 = vector.broadcast %18 : vector<8x1xf32> to vector<8x32xf32>
    %24 = arith.mulf %22, %23 : vector<8x32xf32>
    %25 = vector.broadcast %3 : f32 to vector<8x32xf32>
    %26 = arith.addf %24, %25 : vector<8x32xf32>
    %27 = arith.truncf %26 : vector<8x32xf32> to vector<8x32xbf16>
    %c0_9 = arith.constant 0 : index
    %c0_10 = arith.constant 0 : index
    %28 = vector.load %arg3[%c0_9, %c0_10] : memref<32x96xbf16, #tpu.memory_space<vmem>>, vector<32x96xbf16>
    %cst_11 = arith.constant dense<0.000000e+00> : vector<8x96xf32>
    %29 = tpu.matmul %27, %28, %cst_11 {dimension_numbers = #tpu.dot_dimension_numbers<[1], [0], [0], [1], [0, 0, 1, 1], [], []>} : vector<8x32xbf16>, vector<32x96xbf16>, vector<8x96xf32> -> vector<8x96xf32>
    %c0_12 = arith.constant 0 : index
    %c0_13 = arith.constant 0 : index
    %30 = vector.load %arg4[%c0_12, %c0_13] : memref<1x96xf32, #tpu.memory_space<vmem>>, vector<1x96xf32>
    %31 = vector.broadcast %30 : vector<1x96xf32> to vector<8x96xf32>
    %32 = arith.addf %29, %31 : vector<8x96xf32>
    %33 = vector.extract_strided_slice %32 {offsets = [0, 0], sizes = [8, 8], strides = [1, 1]} : vector<8x96xf32> to vector<8x8xf32>
    %34 = arith.truncf %33 : vector<8x8xf32> to vector<8x8xbf16>
    %35 = vector.extract_strided_slice %32 {offsets = [0, 32], sizes = [8, 8], strides = [1, 1]} : vector<8x96xf32> to vector<8x8xf32>
    %36 = arith.truncf %35 : vector<8x8xf32> to vector<8x8xbf16>
    %37 = vector.extract_strided_slice %32 {offsets = [0, 64], sizes = [8, 8], strides = [1, 1]} : vector<8x96xf32> to vector<8x8xf32>
    %38 = arith.truncf %37 : vector<8x8xf32> to vector<8x8xbf16>
    %cst_14 = arith.constant dense<0.000000e+00> : vector<8x8xf32>
    %39 = tpu.matmul %34, %36, %cst_14 {dimension_numbers = #tpu.dot_dimension_numbers<[1], [1], [0], [0], [0, 0, 1, 0], [], []>} : vector<8x8xbf16>, vector<8x8xbf16>, vector<8x8xf32> -> vector<8x8xf32>
    %cst_15 = arith.constant dense<0xFF800000> : vector<8xf32>
    %40 = vector.multi_reduction <maximumf>, %39, %cst_15 [1] : vector<8x8xf32> to vector<8xf32>
    %41 = vector.shape_cast %40 : vector<8xf32> to vector<8x1xf32>
    %42 = vector.broadcast %41 : vector<8x1xf32> to vector<8x8xf32>
    %43 = arith.subf %39, %42 : vector<8x8xf32>
    %44 = math.exp %43 : vector<8x8xf32>
    %cst_16 = arith.constant dense<0.000000e+00> : vector<8xf32>
    %45 = vector.multi_reduction <add>, %44, %cst_16 [1] : vector<8x8xf32> to vector<8xf32>
    %46 = vector.shape_cast %45 : vector<8xf32> to vector<8x1xf32>
    %47 = tpu.reciprocal %46 {approx = true} : vector<8x1xf32> -> vector<8x1xf32>
    %48 = vector.broadcast %47 : vector<8x1xf32> to vector<8x8xf32>
    %49 = arith.mulf %44, %48 : vector<8x8xf32>
    %50 = arith.truncf %49 : vector<8x8xf32> to vector<8x8xbf16>
    %cst_17 = arith.constant dense<0.000000e+00> : vector<8x8xf32>
    %51 = tpu.matmul %50, %38, %cst_17 {dimension_numbers = #tpu.dot_dimension_numbers<[1], [0], [0], [1], [0, 0, 1, 1], [], []>} : vector<8x8xbf16>, vector<8x8xbf16>, vector<8x8xf32> -> vector<8x8xf32>
    %c0_18 = arith.constant 0 : index
    %c0_19 = arith.constant 0 : index
    %52 = vector.load %arg12[%c0_18, %c0_19] : memref<8x32xf32, #tpu.memory_space<vmem>>, vector<8x8xf32>
    tpu.vector_store %arg12[%c0_18, %c0_19], %51 {strides = array<i32>} : memref<8x32xf32, #tpu.memory_space<vmem>>, vector<8x8xf32>,
    %53 = vector.extract_strided_slice %32 {offsets = [0, 8], sizes = [8, 8], strides = [1, 1]} : vector<8x96xf32> to vector<8x8xf32>
    %54 = arith.truncf %53 : vector<8x8xf32> to vector<8x8xbf16>
    %55 = vector.extract_strided_slice %32 {offsets = [0, 40], sizes = [8, 8], strides = [1, 1]} : vector<8x96xf32> to vector<8x8xf32>
    %56 = arith.truncf %55 : vector<8x8xf32> to vector<8x8xbf16>
    %57 = vector.extract_strided_slice %32 {offsets = [0, 72], sizes = [8, 8], strides = [1, 1]} : vector<8x96xf32> to vector<8x8xf32>
    %58 = arith.truncf %57 : vector<8x8xf32> to vector<8x8xbf16>
    %cst_20 = arith.constant dense<0.000000e+00> : vector<8x8xf32>
    %59 = tpu.matmul %54, %56, %cst_20 {dimension_numbers = #tpu.dot_dimension_numbers<[1], [1], [0], [0], [0, 0, 1, 0], [], []>} : vector<8x8xbf16>, vector<8x8xbf16>, vector<8x8xf32> -> vector<8x8xf32>
    %cst_21 = arith.constant dense<0xFF800000> : vector<8xf32>
    %60 = vector.multi_reduction <maximumf>, %59, %cst_21 [1] : vector<8x8xf32> to vector<8xf32>
    %61 = vector.shape_cast %60 : vector<8xf32> to vector<8x1xf32>
    %62 = vector.broadcast %61 : vector<8x1xf32> to vector<8x8xf32>
    %63 = arith.subf %59, %62 : vector<8x8xf32>
    %64 = math.exp %63 : vector<8x8xf32>
    %cst_22 = arith.constant dense<0.000000e+00> : vector<8xf32>
    %65 = vector.multi_reduction <add>, %64, %cst_22 [1] : vector<8x8xf32> to vector<8xf32>
    %66 = vector.shape_cast %65 : vector<8xf32> to vector<8x1xf32>
    %67 = tpu.reciprocal %66 {approx = true} : vector<8x1xf32> -> vector<8x1xf32>
    %68 = vector.broadcast %67 : vector<8x1xf32> to vector<8x8xf32>
    %69 = arith.mulf %64, %68 : vector<8x8xf32>
    %70 = arith.truncf %69 : vector<8x8xf32> to vector<8x8xbf16>
    %cst_23 = arith.constant dense<0.000000e+00> : vector<8x8xf32>
    %71 = tpu.matmul %70, %58, %cst_23 {dimension_numbers = #tpu.dot_dimension_numbers<[1], [0], [0], [1], [0, 0, 1, 1], [], []>} : vector<8x8xbf16>, vector<8x8xbf16>, vector<8x8xf32> -> vector<8x8xf32>
    %c0_24 = arith.constant 0 : index
    %c8 = arith.constant 8 : index
    %72 = vector.load %arg12[%c0_24, %c8] : memref<8x32xf32, #tpu.memory_space<vmem>>, vector<8x8xf32>
    tpu.vector_store %arg12[%c0_24, %c8], %71 {strides = array<i32>} : memref<8x32xf32, #tpu.memory_space<vmem>>, vector<8x8xf32>,
    %73 = vector.extract_strided_slice %32 {offsets = [0, 16], sizes = [8, 8], strides = [1, 1]} : vector<8x96xf32> to vector<8x8xf32>
    %74 = arith.truncf %73 : vector<8x8xf32> to vector<8x8xbf16>
    %75 = vector.extract_strided_slice %32 {offsets = [0, 48], sizes = [8, 8], strides = [1, 1]} : vector<8x96xf32> to vector<8x8xf32>
    %76 = arith.truncf %75 : vector<8x8xf32> to vector<8x8xbf16>
    %77 = vector.extract_strided_slice %32 {offsets = [0, 80], sizes = [8, 8], strides = [1, 1]} : vector<8x96xf32> to vector<8x8xf32>
    %78 = arith.truncf %77 : vector<8x8xf32> to vector<8x8xbf16>
    %cst_25 = arith.constant dense<0.000000e+00> : vector<8x8xf32>
    %79 = tpu.matmul %74, %76, %cst_25 {dimension_numbers = #tpu.dot_dimension_numbers<[1], [1], [0], [0], [0, 0, 1, 0], [], []>} : vector<8x8xbf16>, vector<8x8xbf16>, vector<8x8xf32> -> vector<8x8xf32>
    %cst_26 = arith.constant dense<0xFF800000> : vector<8xf32>
    %80 = vector.multi_reduction <maximumf>, %79, %cst_26 [1] : vector<8x8xf32> to vector<8xf32>
    %81 = vector.shape_cast %80 : vector<8xf32> to vector<8x1xf32>
    %82 = vector.broadcast %81 : vector<8x1xf32> to vector<8x8xf32>
    %83 = arith.subf %79, %82 : vector<8x8xf32>
    %84 = math.exp %83 : vector<8x8xf32>
    %cst_27 = arith.constant dense<0.000000e+00> : vector<8xf32>
    %85 = vector.multi_reduction <add>, %84, %cst_27 [1] : vector<8x8xf32> to vector<8xf32>
    %86 = vector.shape_cast %85 : vector<8xf32> to vector<8x1xf32>
    %87 = tpu.reciprocal %86 {approx = true} : vector<8x1xf32> -> vector<8x1xf32>
    %88 = vector.broadcast %87 : vector<8x1xf32> to vector<8x8xf32>
    %89 = arith.mulf %84, %88 : vector<8x8xf32>
    %90 = arith.truncf %89 : vector<8x8xf32> to vector<8x8xbf16>
    %cst_28 = arith.constant dense<0.000000e+00> : vector<8x8xf32>
    %91 = tpu.matmul %90, %78, %cst_28 {dimension_numbers = #tpu.dot_dimension_numbers<[1], [0], [0], [1], [0, 0, 1, 1], [], []>} : vector<8x8xbf16>, vector<8x8xbf16>, vector<8x8xf32> -> vector<8x8xf32>
    %c0_29 = arith.constant 0 : index
    %c16 = arith.constant 16 : index
    %92 = vector.load %arg12[%c0_29, %c16] : memref<8x32xf32, #tpu.memory_space<vmem>>, vector<8x8xf32>
    tpu.vector_store %arg12[%c0_29, %c16], %91 {strides = array<i32>} : memref<8x32xf32, #tpu.memory_space<vmem>>, vector<8x8xf32>,
    %93 = vector.extract_strided_slice %32 {offsets = [0, 24], sizes = [8, 8], strides = [1, 1]} : vector<8x96xf32> to vector<8x8xf32>
    %94 = arith.truncf %93 : vector<8x8xf32> to vector<8x8xbf16>
    %95 = vector.extract_strided_slice %32 {offsets = [0, 56], sizes = [8, 8], strides = [1, 1]} : vector<8x96xf32> to vector<8x8xf32>
    %96 = arith.truncf %95 : vector<8x8xf32> to vector<8x8xbf16>
    %97 = vector.extract_strided_slice %32 {offsets = [0, 88], sizes = [8, 8], strides = [1, 1]} : vector<8x96xf32> to vector<8x8xf32>
    %98 = arith.truncf %97 : vector<8x8xf32> to vector<8x8xbf16>
    %cst_30 = arith.constant dense<0.000000e+00> : vector<8x8xf32>
    %99 = tpu.matmul %94, %96, %cst_30 {dimension_numbers = #tpu.dot_dimension_numbers<[1], [1], [0], [0], [0, 0, 1, 0], [], []>} : vector<8x8xbf16>, vector<8x8xbf16>, vector<8x8xf32> -> vector<8x8xf32>
    %cst_31 = arith.constant dense<0xFF800000> : vector<8xf32>
    %100 = vector.multi_reduction <maximumf>, %99, %cst_31 [1] : vector<8x8xf32> to vector<8xf32>
    %101 = vector.shape_cast %100 : vector<8xf32> to vector<8x1xf32>
    %102 = vector.broadcast %101 : vector<8x1xf32> to vector<8x8xf32>
    %103 = arith.subf %99, %102 : vector<8x8xf32>
    %104 = math.exp %103 : vector<8x8xf32>
    %cst_32 = arith.constant dense<0.000000e+00> : vector<8xf32>
    %105 = vector.multi_reduction <add>, %104, %cst_32 [1] : vector<8x8xf32> to vector<8xf32>
    %106 = vector.shape_cast %105 : vector<8xf32> to vector<8x1xf32>
    %107 = tpu.reciprocal %106 {approx = true} : vector<8x1xf32> -> vector<8x1xf32>
    %108 = vector.broadcast %107 : vector<8x1xf32> to vector<8x8xf32>
    %109 = arith.mulf %104, %108 : vector<8x8xf32>
    %110 = arith.truncf %109 : vector<8x8xf32> to vector<8x8xbf16>
    %cst_33 = arith.constant dense<0.000000e+00> : vector<8x8xf32>
    %111 = tpu.matmul %110, %98, %cst_33 {dimension_numbers = #tpu.dot_dimension_numbers<[1], [0], [0], [1], [0, 0, 1, 1], [], []>} : vector<8x8xbf16>, vector<8x8xbf16>, vector<8x8xf32> -> vector<8x8xf32>
    %c0_34 = arith.constant 0 : index
    %c24 = arith.constant 24 : index
    %112 = vector.load %arg12[%c0_34, %c24] : memref<8x32xf32, #tpu.memory_space<vmem>>, vector<8x8xf32>
    tpu.vector_store %arg12[%c0_34, %c24], %111 {strides = array<i32>} : memref<8x32xf32, #tpu.memory_space<vmem>>, vector<8x8xf32>,
    %c0_35 = arith.constant 0 : index
    %c0_36 = arith.constant 0 : index
    %113 = vector.load %arg12[%c0_35, %c0_36] : memref<8x32xf32, #tpu.memory_space<vmem>>, vector<8x32xf32>
    %114 = arith.truncf %113 : vector<8x32xf32> to vector<8x32xbf16>
    %c0_37 = arith.constant 0 : index
    %c0_38 = arith.constant 0 : index
    %115 = vector.load %arg5[%c0_37, %c0_38] : memref<32x32xbf16, #tpu.memory_space<vmem>>, vector<32x32xbf16>
    %cst_39 = arith.constant dense<0.000000e+00> : vector<8x32xf32>
    %116 = tpu.matmul %114, %115, %cst_39 {dimension_numbers = #tpu.dot_dimension_numbers<[1], [0], [0], [1], [0, 0, 1, 1], [], []>} : vector<8x32xbf16>, vector<32x32xbf16>, vector<8x32xf32> -> vector<8x32xf32>
    %c0_40 = arith.constant 0 : index
    %c0_41 = arith.constant 0 : index
    %117 = vector.load %arg6[%c0_40, %c0_41] : memref<1x32xf32, #tpu.memory_space<vmem>>, vector<1x32xf32>
    %118 = vector.broadcast %117 : vector<1x32xf32> to vector<8x32xf32>
    %119 = arith.addf %116, %118 : vector<8x32xf32>
    %120 = arith.addf %1, %119 : vector<8x32xf32>
    %c1_42 = arith.constant 1 : index
    %c0_43 = arith.constant 0 : index
    %121 = memref.load %arg1[%c1_42, %c0_43] : memref<2x2xf32, #tpu.memory_space<smem>>
    %c1_44 = arith.constant 1 : index
    %c1_45 = arith.constant 1 : index
    %122 = memref.load %arg1[%c1_44, %c1_45] : memref<2x2xf32, #tpu.memory_space<smem>>
    %cst_46 = arith.constant dense<0.000000e+00> : vector<8xf32>
    %123 = vector.multi_reduction <add>, %120, %cst_46 [1] : vector<8x32xf32> to vector<8xf32>
    %124 = vector.shape_cast %123 : vector<8xf32> to vector<8x1xf32>
    %cst_47 = arith.constant 3.200000e+01 : f32
    %125 = vector.broadcast %cst_47 : f32 to vector<8x1xf32>
    %126 = arith.divf %124, %125 : vector<8x1xf32>
    %127 = vector.broadcast %126 : vector<8x1xf32> to vector<8x32xf32>
    %128 = arith.subf %120, %127 : vector<8x32xf32>
    %129 = arith.mulf %128, %128 : vector<8x32xf32>
    %cst_48 = arith.constant dense<0.000000e+00> : vector<8xf32>
    %130 = vector.multi_reduction <add>, %129, %cst_48 [1] : vector<8x32xf32> to vector<8xf32>
    %131 = vector.shape_cast %130 : vector<8xf32> to vector<8x1xf32>
    %cst_49 = arith.constant 3.100000e+01 : f32
    %132 = vector.broadcast %cst_49 : f32 to vector<8x1xf32>
    %133 = arith.divf %131, %132 : vector<8x1xf32>
    %134 = math.sqrt %133 : vector<8x1xf32>
    %cst_50 = arith.constant 9.99999997E-7 : f32
    %135 = vector.broadcast %cst_50 : f32 to vector<8x1xf32>
    %136 = arith.addf %134, %135 : vector<8x1xf32>
    %137 = tpu.reciprocal %136 {approx = true} : vector<8x1xf32> -> vector<8x1xf32>
    %138 = vector.broadcast %126 : vector<8x1xf32> to vector<8x32xf32>
    %139 = arith.subf %120, %138 : vector<8x32xf32>
    %140 = vector.broadcast %121 : f32 to vector<8x32xf32>
    %141 = arith.mulf %140, %139 : vector<8x32xf32>
    %142 = vector.broadcast %137 : vector<8x1xf32> to vector<8x32xf32>
    %143 = arith.mulf %141, %142 : vector<8x32xf32>
    %144 = vector.broadcast %122 : f32 to vector<8x32xf32>
    %145 = arith.addf %143, %144 : vector<8x32xf32>
    %146 = arith.truncf %145 : vector<8x32xf32> to vector<8x32xbf16>
    %c0_51 = arith.constant 0 : index
    %c0_52 = arith.constant 0 : index
    %147 = vector.load %arg10[%c0_51, %c0_52] : memref<1x32xf32, #tpu.memory_space<vmem>>, vector<1x32xf32>
    %148 = vector.broadcast %147 : vector<1x32xf32> to vector<8x32xf32>
    %149 = arith.addf %120, %148 : vector<8x32xf32>
    %c0_53 = arith.constant 0 : index
    %c0_54 = arith.constant 0 : index
    %150 = vector.load %arg7[%c0_53, %c0_54] : memref<32x64xbf16, #tpu.memory_space<vmem>>, vector<32x64xbf16>
    %cst_55 = arith.constant dense<0.000000e+00> : vector<8x64xf32>
    %151 = tpu.matmul %146, %150, %cst_55 {dimension_numbers = #tpu.dot_dimension_numbers<[1], [0], [0], [1], [0, 0, 1, 1], [], []>} : vector<8x32xbf16>, vector<32x64xbf16>, vector<8x64xf32> -> vector<8x64xf32>
    %c0_56 = arith.constant 0 : index
    %c0_57 = arith.constant 0 : index
    %152 = vector.load %arg8[%c0_56, %c0_57] : memref<1x64xf32, #tpu.memory_space<vmem>>, vector<1x64xf32>
    %153 = vector.broadcast %152 : vector<1x64xf32> to vector<8x64xf32>
    %154 = arith.addf %151, %153 : vector<8x64xf32>
    %cst_58 = arith.constant 0.000000e+00 : f32
    %155 = vector.broadcast %cst_58 : f32 to vector<8x64xf32>
    %156 = arith.maximumf %154, %155 : vector<8x64xf32>
    %157 = arith.truncf %156 : vector<8x64xf32> to vector<8x64xbf16>
    %c0_59 = arith.constant 0 : index
    %c0_60 = arith.constant 0 : index
    %158 = vector.load %arg9[%c0_59, %c0_60] : memref<64x32xbf16, #tpu.memory_space<vmem>>, vector<64x32xbf16>
    %cst_61 = arith.constant dense<0.000000e+00> : vector<8x32xf32>
    %159 = tpu.matmul %157, %158, %cst_61 {dimension_numbers = #tpu.dot_dimension_numbers<[1], [0], [0], [1], [0, 0, 1, 1], [], []>} : vector<8x64xbf16>, vector<64x32xbf16>, vector<8x32xf32> -> vector<8x32xf32>
    %160 = arith.addf %149, %159 : vector<8x32xf32>
    %c0_62 = arith.constant 0 : index
    %c0_63 = arith.constant 0 : index
    %c0_64 = arith.constant 0 : index
    %161 = vector.load %arg11[%c0_62, %c0_63, %c0_64] : memref<1x8x32xf32, #tpu.memory_space<vmem>>, vector<1x8x32xf32>
    %162 = vector.shape_cast %161 : vector<1x8x32xf32> to vector<8x32xf32>
    %163 = vector.shape_cast %160 : vector<8x32xf32> to vector<1x8x32xf32>
    tpu.vector_store %arg11[%c0_62, %c0_63, %c0_64], %163 {strides = array<i32>} : memref<1x8x32xf32, #tpu.memory_space<vmem>>, vector<1x8x32xf32>,
    return
  }
  func.func @transform_0(%arg0: i32) -> (i32, i32) {
    %c0_i32 = arith.constant 0 : i32
    %c0_i32_0 = arith.constant 0 : i32
    %c0_i32_1 = arith.constant 0 : i32
    return %c0_i32, %c0_i32_0 : i32, i32
  }
  func.func @transform_1(%arg0: i32) -> (i32, i32, i32) {
    %c0_i32 = arith.constant 0 : i32
    %c0_i32_0 = arith.constant 0 : i32
    %c0_i32_1 = arith.constant 0 : i32
    return %arg0, %c0_i32, %c0_i32_0 : i32, i32, i32
  }
  func.func @transform_2(%arg0: i32) -> (i32, i32) {
    %c0_i32 = arith.constant 0 : i32
    %c0_i32_0 = arith.constant 0 : i32
    %c0_i32_1 = arith.constant 0 : i32
    return %c0_i32, %c0_i32_0 : i32, i32
  }
  func.func @transform_3(%arg0: i32) -> (i32, i32) {
    %c0_i32 = arith.constant 0 : i32
    %c0_i32_0 = arith.constant 0 : i32
    %c0_i32_1 = arith.constant 0 : i32
    return %c0_i32, %c0_i32_0 : i32, i32
  }
  func.func @transform_4(%arg0: i32) -> (i32, i32) {
    %c0_i32 = arith.constant 0 : i32
    %c0_i32_0 = arith.constant 0 : i32
    %c0_i32_1 = arith.constant 0 : i32
    return %c0_i32, %c0_i32_0 : i32, i32
  }
  func.func @transform_5(%arg0: i32) -> (i32, i32) {
    %c0_i32 = arith.constant 0 : i32
    %c0_i32_0 = arith.constant 0 : i32
    %c0_i32_1 = arith.constant 0 : i32
    return %c0_i32, %c0_i32_0 : i32, i32
  }
  func.func @transform_6(%arg0: i32) -> (i32, i32) {
    %c0_i32 = arith.constant 0 : i32
    %c0_i32_0 = arith.constant 0 : i32
    %c0_i32_1 = arith.constant 0 : i32
    return %c0_i32, %c0_i32_0 : i32, i32
  }
  func.func @transform_7(%arg0: i32) -> (i32, i32) {
    %c0_i32 = arith.constant 0 : i32
    %c0_i32_0 = arith.constant 0 : i32
    %c0_i32_1 = arith.constant 0 : i32
    return %c0_i32, %c0_i32_0 : i32, i32
  }
  func.func @transform_8(%arg0: i32) -> (i32, i32) {
    %c0_i32 = arith.constant 0 : i32
    %c0_i32_0 = arith.constant 0 : i32
    %c0_i32_1 = arith.constant 0 : i32
    return %c0_i32, %c0_i32_0 : i32, i32
  }
  func.func @transform_9(%arg0: i32) -> (i32, i32) {
    %c0_i32 = arith.constant 0 : i32
    %c0_i32_0 = arith.constant 0 : i32
    %c0_i32_1 = arith.constant 0 : i32
    return %c0_i32, %c0_i32_0 : i32, i32
  }
  func.func @transform_10(%arg0: i32) -> (i32, i32, i32) {
    %c0_i32 = arith.constant 0 : i32
    %c0_i32_0 = arith.constant 0 : i32
    %c0_i32_1 = arith.constant 0 : i32
    return %arg0, %c0_i32, %c0_i32_0 : i32, i32, i32
  }
}

</mosaic_0001>

<bundles_post_ra>
// kernel: tpu_custom_call.1
= control target key start
LH: loop header
LB: loop body
LE: loop exit
PB: predicated region body
PF: predicated region fallthrough
CT: control target
= control target key end

     0   :  { %15 = vsyncpa [#allocation6], 0  ;;  %s2009_s0 = inlined_call_operand.hbm [shape: f32[2,2], index: 0, kind: input, shape index: {}]   ;;  %s2010_s1 = inlined_call_operand.vmem [shape: f32[2,8,32], index: 1, kind: input, shape index: {}]   ;;  %s2011_s2 = inlined_call_operand.vmem [shape: bf16[32,96], index: 2, kind: input, shape index: {}]   ;;  %s2012_s3 = inlined_call_operand.vmem [shape: f32[1,96], index: 3, kind: input, shape index: {}]   ;;  %s2013_s4 = inlined_call_operand.vmem [shape: bf16[32,32], index: 4, kind: input, shape index: {}]   ;;  %s2014_s5 = inlined_call_operand.vmem [shape: f32[1,32], index: 5, kind: input, shape index: {}]   ;;  %s2015_s6 = inlined_call_operand.hbm [shape: bf16[32,64], index: 6, kind: input, shape index: {}]   ;;  %s2016_s7 = inlined_call_operand.vmem [shape: f32[1,64], index: 7, kind: input, shape index: {}]   ;;  %s2017_s8 = inlined_call_operand.vmem [shape: bf16[64,32], index: 8, kind: input, shape index: {}]   ;;  %s2018_s9 = inlined_call_operand.vmem [shape: f32[1,32], index: 9, kind: input, shape index: {}]   ;;  %s2019_s10 = inlined_call_operand.hbm [shape: f32[2,8,32], index: 10, kind: output, shape index: {}]  }
   0x1   :  { %16 = vsyncpa [#allocation4], 0 }
   0x2   :  { %17 = vsyncpa [#allocation5], 0 }
   0x3   :  { %19 = vsyncpa [#allocation5 + $0x1], 0  ;;  %s1740_s13 = smov 0   ;;  %s1742_s14 = smov 0  }
   0x4   :  { %s1744_s15 = smov 0   ;;  %s1746_s16 = smov 0  }
   0x5 LB: > { %s1761_s17 = sadd.s32 4294967295, %s1662_s16   ;;  %s1288_s18 = sadd.s32 4294967294, %s1662_s16   ;;  %s1662_s16 = sphi %s1746_s16, %s2027_s16   ;;  %s1658_s15 = sphi %s1744_s15, %s2026_s15   ;;  %s1654_s14 = sphi %s1742_s14, %s2025_s14   ;;  %s1650_s13 = sphi %s1740_s13, %s2024_s13  }
   0x6   : > { %s1765_s19 = sadd.s32 1, %s1662_s16   ;;  %s247_s20 = sadd.s32 1, %s1658_s15 }
   0x7   : > { %s244_s21 = ssub.s32 %s1662_s16, %s1765_s19  ;;  %p257_p0 = scmp.ne.s32.totalorder %s1658_s15, %s1654_s14 }
   0x8   : > { %p245_p1 = scmp.eq.s32.totalorder %s244_s21, 0  ;;  %p258_p2 = scmp.eq.s32.totalorder %s1761_s17, 1 }
   0x9   : > { %p263_p3 = scmp.ne.s32.totalorder %s1654_s14, %s1650_s13  ;;  %p264_p4 = scmp.eq.s32.totalorder %s1288_s18, 1 }
   0xa   : > { %s1776_s22 = scalar_select %p245_p1, %s1658_s15, %s247_s20  }
   0xb   : > { %p1778_p5 = por %p258_p2, %p257_p0  ;;  %p1782_p6 = por %p264_p4, %p263_p3 }
   0xc   : > { %p1289_p7 = scmp.ge.s32.totalorder %s1662_s16, 1  ;;  %p271_p8 = scmp.lt.s32.totalorder %s1662_s16, 3 }
   0xd   : > { %p1466_p10 = scmp.eq.s32.totalorder %s1761_s17, 0  ;;  %s1664_s26 = smov [#allocation7]  }
   0xe   : > { %p1788_p9 = pnand %p1289_p7, %p271_p8  ;;  %s304_s27 = sshll.u32 %s1664_s26, 4  ;;  %s305_s27 = int_to_ptr.vmem [resolvable:$true] %s304_s27 }
   0xf   : > { %s1665_s29 = smov [#allocation3]   ;;  %s1579_s12 = scalar_lea.vmem %s305_s27, 256 }
  0x10   : > { %p1455_p11 = pneg %p1788_p9  ;;  %p1580_p0 = scmp.ne.s32.totalorder %s305_s27, %s1579_s12 }
  0x11   : > { %p1587_p3 = scmp.lt.s32.totalorder %s305_s27, %s305_s27  ;;  %p1588_p4 = scmp.lt.s32.totalorder %s1579_s12, %s1579_s12 }
  0x12   : > { %p1797_p12 = pnand %p1466_p10, %p1455_p11 }
  0x13   : > { %p1589_p7 = por %p1588_p4, %p1587_p3 }
  0x14   : > { %1458 = dma.hbm_to_smem (!%p1797_p12), %s2009_s0, 32, %s1665_s29, [#allocation6]  }
  0x15   : > { %p1570_p13 = pneg %p1797_p12 }
  0x17   : > { %p1582_p1 = pnand %p1580_p0, %p1570_p13 }
  0x19   : > { %p1583_p2 = pneg %p1582_p1 }
  0x1b   : > { %p1590_p8 = pnand %p1589_p7, %p1583_p2 }
  0x1d   : > { %1593 = shalt.err (!%p1590_p8)
}
  0x1e   : > { %s1666_s18 = smov 64   ;;  %s1667_s20 = smov 4  }
  0x1f   : > { %1461 = dma.hbm_to_vmem [thread:$0]  (!%p1797_p12), %s2015_s6, 256, %s305_s27, [#allocation4], %s1666_s18, %s1666_s18, %s1667_s20  }
  0x20   : > { %336 = sbr.rel (%p1788_p9) target bundleno = 2512 (0x9d0), region = 60 }
  0x25   : > { %1637 = dma.done.wait (%p1466_p10), [#allocation6], 32  }
  0x26   : > { %1639 = vsyncadd (%p1466_p10), [#allocation6], 4294967264 }
  0x27   : > { %1641 = dma.done.wait (%p1466_p10), [#allocation4], 256  }
  0x28   : > { %1643 = vsyncadd (%p1466_p10), [#allocation4], 4294967040 }
  0x29   : > { %346 = sfence }
  0x2a   : > { %p378_p11 = scmp.lt.s32.totalorder %s1761_s17, 1  ;;  %vm386_vm0 = vcmask 261120   ;;  %v1523_v7 = vld [vmem:[%s2011_s2 + $0x8] sm:$0xff]   ;;  %v1668_v8 = vmov 0.0   ;;  %vm1669_vm1 = vmmov 0   ;;  %v1524_v9 = vld [vmem:[%s2011_s2] sm:$0xff]  }
  0x2b   : > { %1361 = vmatprep.subr.bf16.mxu0 %v1668_v8  ;;  %1365 = vmatprep.mubr.msk.bf16.mxu0 %vm1669_vm1, %v1668_v8  ;;  %s384_s21 = sld [smem:[#allocation3]]  ;;  %v1299_v25 = vld [vmem:[%s2012_s3] ss:$0 sm:$0xff]  ;;  %s1670_s25 = smov 120   ;;  %vm484_vm4 = vcmask 64512   ;;  %vm548_vm5 = vcmask 1043456  }
  0x2c   : > { %s379_s27 = scalar_select %p378_p11, %s1761_s17, 1  ;;  %1362 = vmatpush3.bf16.msra.mxu0 %v1523_v7  ;;  %1369 = vmatprep.subr.bf16.mxu1 %v1668_v8  ;;  %vm707_vm6 = vcmask 130112   ;;  %vm823_vm7 = vcmask 195712   ;;  %vm939_vm8 = vcmask 261312   ;;  %vm1145_vm11 = vcmask 523264  }
  0x2d   : > { %1363 = vmatprep.subr.bf16.mxu0 %v1668_v8  ;;  %1371 = vmatprep.mubr.msk.bf16.mxu1 %vm1669_vm1, %v1668_v8  ;;  %s1298_s26 = sld [smem:[#allocation3 + $0x1]]  ;;  %s1671_s29 = smov 96  }
  0x2e   : > { %s1297_s28 = sshll.u32 %s379_s27, 3  ;;  %s1673_s11 = smov 80  }
  0x2f   : > { %s381_s30 = scalar_lea.vmem %s2010_s1, %s1297_s28  ;;  %s1674_s12 = smov 112  }
  0x30   : > { %v1828_v0 = vld [vmem:[%s381_s30] sm:$0xff]  ;;  %1364 = vmatpush3.bf16.msra.mxu0 %v1524_v9  ;;  %s1672_s30 = smov 88   ;;  %s1675_s18 = smov 72  }
  0x31   : > { %v387_v1 = vsel %vm386_vm0, %v1828_v0, 0.0  ;;  %1375 = vmatprep.subr.bf16.mxu0 %v1668_v8  ;;  %v408_v18 = vstv %s384_s21  ;;  %s1676_s20 = smov 104   ;;  %s1677_s21 = smov 64  }
  0x32   : > { %388 = vadd.xlane.f32.xlu0 %v387_v1  ;;  %s1679_s27 = smov 48   ;;  %s1680_s28 = smov 40  }
  0x33   : > { %v411_v21 = vstv %s1298_s26  ;;  %s1678_s26 = smov 56  }
  0xbb   : > { %v389_v2 = vpop.xlane.xlu0 %388 }
  0xbc   : > { %v391_v3 = vmul.f32 0.03125, %v389_v2 }
  0xbe   : > { %v392_v4 = vsub.f32 %v1828_v0, %v391_v3 }
  0xc0   : > { %v393_v5 = vmul.f32 %v392_v4, %v392_v4  ;;  %v409_v19 = vmul.f32 %v408_v18, %v392_v4 }
  0xc2   : > { %v394_v6 = vsel %vm386_vm0, %v393_v5, 0.0 }
  0xc3   : > { %395 = vadd.xlane.f32.xlu0 %v394_v6 }
 0x14c   : > { %v396_v10 = vpop.xlane.xlu0 %395 }
 0x14d   : > { %v398_v11 = vmul.f32 0.032258064, %v396_v10 }
 0x14f   : > { %1533 = vrsqrt.f32 %v398_v11  ;;  %vm401_vm2 = vcmp.eq.f32.partialorder %v398_v11, inf  ;;  %v404_v14 = vand.u32 2147483648, %v398_v11  ;;  %vm403_vm3 = vcmp.eq.f32.partialorder %v398_v11, 0.0 }
 0x15c   : > { %v1534_v12 = vpop.eup %1533 }
 0x15d   : > { %v400_v13 = vmul.f32 %v1534_v12, %v398_v11 }
 0x15f   : > { %v402_v15 = vsel %vm401_vm2, %v398_v11, %v400_v13 }
 0x160   : > { %v405_v16 = vsel %vm403_vm3, %v404_v14, %v402_v15 }
 0x161   : > { %v406_v17 = vadd.f32 1e-06, %v405_v16 }
 0x163   : > { %1535 = vrcp.f32 %v406_v17 }
 0x170   : > { %v1536_v20 = vpop.eup %1535 }
 0x171   : > { %v410_v22 = vmul.f32 %v1536_v20, %v409_v19 }
 0x173   : > { %v412_v23 = vadd.f32 %v411_v21, %v410_v22 }
 0x175   : > { %v413_v24 = vpack.c.bf16 %v412_v23, %v412_v23 }
 0x177   : > { %1366 = vmatmul.mubr.msk.bf16.vlgmr.msra.gmra.mxu0 %vm386_vm0, %v413_v24 }
 0x178   : > { %1377 = vmatprep.mubr.msk.bf16.mxu0 %vm1669_vm1, %v1668_v8 }
 0x237   : > { %v474_v26 = vpop.f32.mrf.mxu0 }
 0x238   : > { %v475_v27 = vadd.f32 %v1299_v25, %v474_v26 }
 0x239   : > { %v1367_v28 = vpop.f32.mrf.mxu0 }
 0x23a   : > { %v1854_v29 = vpack.c.bf16 %v475_v27, %v475_v27 }
 0x23b   : > { %v477_v30 = vpop.f32.mrf.mxu0 }
 0x23c   : > { %593 = vrot.lane.b32.xlu0 %v1854_v29, %s1670_s25  ;;  %482 = vrot.lane.b32.xlu1 %v1854_v29, %s1671_s29  ;;  %s1681_s25 = smov 8  }
 0x23d   : > { %v1368_v31 = vpop.f32.mrf.mxu0 }
 0x240   : > { %595 = vrot.lane.b32.xlu1 %v1854_v29, %s1672_s30  ;;  %s1315_s30 = sld [smem:[#allocation3 + $0x80]] }
 0x244   : > { %711 = vrot.lane.b32.xlu1 %v1854_v29, %s1673_s11  ;;  %s1316_s11 = sld [smem:[#allocation3 + $0x81]] }
 0x248   : > { %709 = vrot.lane.b32.xlu1 %v1854_v29, %s1674_s12 }
 0x24c   : > { %827 = vrot.lane.b32.xlu1 %v1854_v29, %s1675_s18  ;;  %s1682_s18 = smov 16  }
 0x250   : > { %825 = vrot.lane.b32.xlu1 %v1854_v29, %s1676_s20  ;;  %s1683_s20 = smov 24  }
 0x2ae   : > { %v483_v32 = vpop.permute.xlu1 %482  ;;  %v594_v37 = vpop.permute.xlu0 %593 }
 0x2af   : > { %v489_v33 = vsel %vm484_vm4, %v483_v32, 0 }
 0x2b0   : > { %1370 = vmatpush3.bf16.xpose.msra.mxu1 %v489_v33 }
 0x2b1   : > { %1381 = vmatprep.subr.bf16.mxu1 %v1668_v8 }
 0x2b2   : > { %v596_v34 = vpop.permute.xlu1 %595 }
 0x2b3   : > { %v601_v35 = vsel %vm484_vm4, %v596_v34, 0 }
 0x2b6   : > { %v712_v36 = vpop.permute.xlu1 %711 }
 0x2b7   : > { %1372 = vmatmul.mubr.msk.bf16.vlgmr.msra.gmra.mxu1 %vm484_vm4, %v1854_v29  ;;  %v717_v39 = vsel %vm484_vm4, %v712_v36, 0 }
 0x2b8   : > { %1382 = vmatpush3.bf16.xpose.msra.mxu1 %v601_v35  ;;  %1383 = vmatprep.mubr.msk.bf16.mxu1 %vm1669_vm1, %v1668_v8 }
 0x2b9   : > { %1393 = vmatprep.subr.bf16.mxu1 %v1668_v8 }
 0x2ba   : > { %v710_v38 = vpop.permute.xlu1 %709 }
 0x2be   : > { %v828_v40 = vpop.permute.xlu1 %827 }
 0x2bf   : > { %1384 = vmatmul.mubr.msk.bf16.vlgmr.msra.gmra.mxu1 %vm484_vm4, %v594_v37  ;;  %v833_v41 = vsel %vm484_vm4, %v828_v40, 0 }
 0x2c0   : > { %1394 = vmatpush3.bf16.xpose.msra.mxu1 %v717_v39  ;;  %1395 = vmatprep.mubr.msk.bf16.mxu1 %vm1669_vm1, %v1668_v8 }
 0x2c1   : > { %1405 = vmatprep.subr.bf16.mxu1 %v1668_v8 }
 0x2c2   : > { %v826_v42 = vpop.permute.xlu1 %825 }
 0x2c7   : > { %1396 = vmatmul.mubr.msk.bf16.vlgmr.msra.gmra.mxu1 %vm484_vm4, %v710_v38 }
 0x2c8   : > { %1406 = vmatpush3.bf16.xpose.msra.mxu1 %v833_v41  ;;  %1407 = vmatprep.mubr.msk.bf16.mxu1 %vm1669_vm1, %v1668_v8 }
 0x2c9   : > { %1417 = vmatprep.subr.bf16.mxu1 %v1668_v8 }
 0x2cf   : > { %1408 = vmatmul.mubr.msk.bf16.vlgmr.msra.gmra.mxu1 %vm484_vm4, %v826_v42 }
 0x2d0   : > { %1421 = vmatprep.mubr.msk.bf16.mxu1 %vm1669_vm1, %v1668_v8 }
 0x377   : > { %v525_v43 = vpop.f32.mrf.mxu1 }
 0x378   : > { %v531_v44 = vsel %vm484_vm4, %v525_v43, -inf }
 0x379   : > { %532 = vmax.xlane.f32.xlu1 %v531_v44  ;;  %v1373_v45 = vpop.f32.mrf.mxu1 }
 0x37b   : > { %v528_v46 = vpop.f32.mrf.mxu1 }
 0x37d   : > { %v1374_v47 = vpop.f32.mrf.mxu1 }
 0x37f   : > { %v637_v48 = vpop.f32.mrf.mxu1 }
 0x380   : > { %v643_v49 = vsel %vm484_vm4, %v637_v48, -inf }
 0x381   : > { %644 = vmax.xlane.f32.xlu0 %v643_v49  ;;  %v1385_v50 = vpop.f32.mrf.mxu1 }
 0x383   : > { %v640_v51 = vpop.f32.mrf.mxu1 }
 0x385   : > { %v1386_v52 = vpop.f32.mrf.mxu1 }
 0x387   : > { %v753_v53 = vpop.f32.mrf.mxu1 }
 0x388   : > { %v759_v54 = vsel %vm484_vm4, %v753_v53, -inf }
 0x389   : > { %760 = vmax.xlane.f32.xlu1 %v759_v54  ;;  %v1397_v55 = vpop.f32.mrf.mxu1  ;;  %v1526_v54 = vld [vmem:[%s2013_s4] sm:$0xff]  }
 0x38b   : > { %v756_v56 = vpop.f32.mrf.mxu1 }
 0x38d   : > { %v1398_v57 = vpop.f32.mrf.mxu1 }
 0x38f   : > { %v869_v58 = vpop.f32.mrf.mxu1 }
 0x390   : > { %v875_v59 = vsel %vm484_vm4, %v869_v58, -inf }
 0x391   : > { %876 = vmax.xlane.f32.xlu0 %v875_v59  ;;  %v1409_v60 = vpop.f32.mrf.mxu1 }
 0x393   : > { %v872_v61 = vpop.f32.mrf.mxu1 }
 0x395   : > { %v1410_v62 = vpop.f32.mrf.mxu1 }
 0x402   : > { %v533_v63 = vpop.xlane.xlu1 %532 }
 0x403   : > { %v534_v1 = vsub.f32 %v525_v43, %v533_v63 }
 0x405   : > { %v535_v2 = vmul.f32 1.442695, %v534_v1 }
 0x407   : > { %1537 = vpow2.f32 %v535_v2 }
 0x40a   : > { %v645_v3 = vpop.xlane.xlu0 %644 }
 0x40b   : > { %v646_v4 = vsub.f32 %v637_v48, %v645_v3 }
 0x40d   : > { %v647_v5 = vmul.f32 1.442695, %v646_v4 }
 0x40f   : > { %1539 = vpow2.f32 %v647_v5  ;;  %v1311_v5 = vld [vmem:[%s2014_s5] ss:$0 sm:$0xff] }
 0x412   : > { %v761_v16 = vpop.xlane.xlu1 %760 }
 0x413   : > { %v762_v17 = vsub.f32 %v753_v53, %v761_v16  ;;  %v1525_v53 = vld [vmem:[%s2013_s4 + $0x8] sm:$0xff]  }
 0x414   : > { %v1538_v6 = vpop.eup %1537  ;;  %1418 = vmatpush3.bf16.msra.mxu1 %v1525_v53 }
 0x415   : > { %v537_v7 = vsel %vm484_vm4, %v1538_v6, 0.0  ;;  %v763_v18 = vmul.f32 1.442695, %v762_v17  ;;  %1419 = vmatprep.subr.bf16.mxu1 %v1668_v8 }
 0x416   : > { %538 = vadd.xlane.f32.xlu1 %v537_v7 }
 0x418   : > { %1420 = vmatpush3.bf16.msra.mxu1 %v1526_v54 }
 0x419   : > { %1433 = vmatprep.subr.bf16.mxu1 %v1668_v8 }
 0x41a   : > { %v877_v9 = vpop.xlane.xlu0 %876 }
 0x41b   : > { %v878_v10 = vsub.f32 %v869_v58, %v877_v9 }
 0x41c   : > { %v1540_v11 = vpop.eup %1539 }
 0x41d   : > { %v879_v12 = vmul.f32 1.442695, %v878_v10  ;;  %v649_v13 = vsel %vm484_vm4, %v1540_v11, 0.0 }
 0x41e   : > { %650 = vadd.xlane.f32.xlu0 %v649_v13 }
 0x41f   : > { %1541 = vpow2.f32 %v879_v12 }
 0x420   : > { %1543 = vpow2.f32 %v763_v18 }
 0x427   : > { %543 = vrot.lane.b32.xlu1 %v1854_v29, %s1677_s21 }
 0x42c   : > { %v1542_v14 = vpop.eup %1541 }
 0x42d   : > { %v881_v15 = vsel %vm484_vm4, %v1542_v14, 0.0  ;;  %v1544_v19 = vpop.eup %1543 }
 0x42e   : > { %882 = vadd.xlane.f32.xlu0 %v881_v15  ;;  %v765_v20 = vsel %vm484_vm4, %v1544_v19, 0.0 }
 0x444   : > { %655 = vrot.lane.b32.xlu0 %v1854_v29, %s1678_s26 }
 0x44b   : > { %766 = vadd.xlane.f32.xlu1 %v765_v20  ;;  %v1528_v20 = vld [vmem:[#allocation7] sm:$0xff]  }
 0x45c   : > { %771 = vrot.lane.b32.xlu1 %v1854_v29, %s1679_s27 }
 0x460   : > { %887 = vrot.lane.b32.xlu1 %v1854_v29, %s1680_s28  ;;  %s375_s28 = sand.u32 1, %s1654_s14  }
 0x49f   : > { %v539_v21 = vpop.xlane.xlu1 %538 }
 0x4a0   : > { %1545 = vrcp.f32 %v539_v21  ;;  %v1530_v21 = vld [vmem:[%s2017_s8 + $0x10] sm:$0xff]  }
 0x4a3   : > { %v544_v22 = vpop.permute.xlu1 %543 }
 0x4a4   : > { %v550_v23 = vsel %vm548_vm5, %v544_v22, 0 }
 0x4a5   : > { %1376 = vmatpush3.bf16.msra.mxu0 %v550_v23 }
 0x4a6   : > { %1387 = vmatprep.subr.bf16.mxu0 %v1668_v8 }
 0x4a7   : > { %v651_v24 = vpop.xlane.xlu0 %650 }
 0x4a8   : > { %1547 = vrcp.f32 %v651_v24 }
 0x4ad   : > { %v1546_v25 = vpop.eup %1545 }
 0x4ae   : > { %v541_v26 = vmul.f32 %v1546_v25, %v1538_v6 }
 0x4b0   : > { %v542_v27 = vpack.c.bf16 %v541_v26, %v541_v26 }
 0x4b2   : > { %1378 = vmatmul.mubr.msk.bf16.vlgmr.msra.gmra.mxu0 %vm484_vm4, %v542_v27 }
 0x4b3   : > { %1389 = vmatprep.mubr.msk.bf16.mxu0 %vm1669_vm1, %v1668_v8 }
 0x4b5   : > { %v1548_v28 = vpop.eup %1547 }
 0x4b6   : > { %v653_v30 = vmul.f32 %v1548_v28, %v1540_v11 }
 0x4b7   : > { %v883_v29 = vpop.xlane.xlu0 %882 }
 0x4b8   : > { %v654_v33 = vpack.c.bf16 %v653_v30, %v653_v30  ;;  %v1031_v30 = vstv %s1315_s30 }
 0x4bb   : > { %v656_v31 = vpop.permute.xlu0 %655 }
 0x4bc   : > { %v661_v32 = vsel %vm548_vm5, %v656_v31, 0 }
 0x4bd   : > { %1388 = vmatpush3.bf16.msra.mxu0 %v661_v32 }
 0x4be   : > { %1399 = vmatprep.subr.bf16.mxu0 %v1668_v8 }
 0x4c0   : > { %1390 = vmatmul.mubr.msk.bf16.vlgmr.msra.gmra.mxu0 %vm484_vm4, %v654_v33  ;;  %v1034_v33 = vstv %s1316_s11  ;;  %s1328_s11 = sshll.u32 %s1761_s17, 7  ;;  %s1192_s17 = scalar_lea.sflag [#allocation5], %s375_s28 }
 0x4c1   : > { %1401 = vmatprep.mubr.msk.bf16.mxu0 %vm1669_vm1, %v1668_v8  ;;  %s1967_s26 = scalar_lea.hbm %s2019_s10, %s1328_s11 }
 0x4d4   : > { %v767_v34 = vpop.xlane.xlu1 %766 }
 0x4d5   : > { %1549 = vrcp.f32 %v767_v34 }
 0x4d6   : > { %1551 = vrcp.f32 %v883_v29 }
 0x4d8   : > { %v772_v35 = vpop.permute.xlu1 %771 }
 0x4d9   : > { %v777_v36 = vsel %vm548_vm5, %v772_v35, 0 }
 0x4da   : > { %1400 = vmatpush3.bf16.msra.mxu0 %v777_v36 }
 0x4db   : > { %1411 = vmatprep.subr.bf16.mxu0 %v1668_v8 }
 0x4dc   : > { %v888_v39 = vpop.permute.xlu1 %887 }
 0x4dd   : > { %v893_v42 = vsel %vm548_vm5, %v888_v39, 0  ;;  %v1318_v39 = vld [vmem:[%s2016_s7] ss:$0 sm:$0xff] }
 0x4e2   : > { %v1550_v37 = vpop.eup %1549 }
 0x4e3   : > { %v769_v38 = vmul.f32 %v1550_v37, %v1544_v19  ;;  %v1552_v41 = vpop.eup %1551  ;;  %v1527_v19 = vld [vmem:[#allocation7 + $0x8] sm:$0xff]   ;;  %v1531_v37 = vld [vmem:[%s2017_s8 + $0x8] sm:$0xff]  }
 0x4e4   : > { %v885_v43 = vmul.f32 %v1552_v41, %v1542_v14 }
 0x4e5   : > { %v770_v40 = vpack.c.bf16 %v769_v38, %v769_v38  ;;  %v1532_v38 = vld [vmem:[%s2017_s8] sm:$0xff]  }
 0x4e6   : > { %v886_v44 = vpack.c.bf16 %v885_v43, %v885_v43 }
 0x4e7   : > { %1402 = vmatmul.mubr.msk.bf16.vlgmr.msra.gmra.mxu0 %vm484_vm4, %v770_v40 }
 0x4e8   : > { %1412 = vmatpush3.bf16.msra.mxu0 %v893_v42  ;;  %1413 = vmatprep.mubr.msk.bf16.mxu0 %vm1669_vm1, %v1668_v8 }
 0x4e9   : > { %1425 = vmatprep.subr.bf16.mxu0 %v1668_v8 }
 0x4ef   : > { %1414 = vmatmul.mubr.msk.bf16.vlgmr.msra.gmra.mxu0 %vm484_vm4, %v886_v44 }
 0x4f0   : > { %1429 = vmatprep.mubr.msk.bf16.mxu0 %vm1669_vm1, %v1668_v8  ;;  %1426 = vmatpush3.bf16.msra.mxu0 %v1527_v19 }
 0x4f1   : > { %1427 = vmatprep.subr.bf16.mxu0 %v1668_v8 }
 0x4f4   : > { %1428 = vmatpush3.bf16.msra.mxu0 %v1528_v20 }
 0x572   : > { %v586_v45 = vpop.f32.mrf.mxu0 }
 0x573   : > { %592 = vst.msk [vmem:[#allocation2] sm:$0xff] %vm484_vm4, %v586_v45 }
 0x574   : > { %v1379_v46 = vpop.f32.mrf.mxu0 }
 0x576   : > { %v589_v47 = vpop.f32.mrf.mxu0 }
 0x578   : > { %v1380_v48 = vpop.f32.mrf.mxu0 }
 0x580   : > { %v697_v49 = vpop.f32.mrf.mxu0 }
 0x581   : > { %704 = vrot.lane.b32.xlu0 %v697_v49, %s1681_s25  ;;  %s1296_s25 = sshll.u32 %s375_s28, 3 }
 0x582   : > { %v1391_v50 = vpop.f32.mrf.mxu0  ;;  %s377_s12 = scalar_lea.vmem [#allocation8], %s1296_s25  ;;  %s1684_s25 = smov [#allocation8]  }
 0x583   : > { %s1598_s29 = sshll.u32 %s1684_s25, 4  ;;  %s1599_s29 = int_to_ptr.vmem [resolvable:$false] %s1598_s29 }
 0x584   : > { %v700_v51 = vpop.f32.mrf.mxu0  ;;  %s1600_s30 = scalar_lea.vmem %s1599_s29, 256 }
 0x586   : > { %v1392_v52 = vpop.f32.mrf.mxu0 }
 0x5a7   : > { %v813_v55 = vpop.f32.mrf.mxu0 }
 0x5a8   : > { %820 = vrot.lane.b32.xlu1 %v813_v55, %s1682_s18  ;;  %s1205_s18 = sshll.u32 %s377_s12, 4  ;;  %s1969_s18 = int_to_ptr.vmem [resolvable:$true] %s1205_s18 }
 0x5a9   : > { %v1403_v56 = vpop.f32.mrf.mxu0  ;;  %s1594_s27 = scalar_lea.vmem %s1969_s18, 128  ;;  %p1601_p13 = scmp.lt.s32.totalorder %s1969_s18, %s1599_s29 }
 0x5aa   : > { %p1595_p9 = scmp.ne.s32.totalorder %s1969_s18, %s1594_s27  ;;  %p1602_p0 = scmp.lt.s32.totalorder %s1600_s30, %s1594_s27 }
 0x5ab   : > { %v816_v57 = vpop.f32.mrf.mxu0 }
 0x5ac   : > { %p1596_p10 = pnand %p1595_p9, %p1778_p5  ;;  %p1603_p1 = por %p1602_p0, %p1601_p13 }
 0x5ad   : > { %v1404_v58 = vpop.f32.mrf.mxu0 }
 0x5ae   : > { %p1597_p12 = pneg %p1596_p10 }
 0x5af   : > { %v929_v59 = vpop.f32.mrf.mxu0 }
 0x5b0   : > { %936 = vrot.lane.b32.xlu0 %v929_v59, %s1683_s20  ;;  %p1604_p2 = pnand %p1603_p1, %p1597_p12 }
 0x5b1   : > { %v1415_v60 = vpop.f32.mrf.mxu0 }
 0x5b3   : > { %v932_v61 = vpop.f32.mrf.mxu0 }
 0x5b5   : > { %v1416_v62 = vpop.f32.mrf.mxu0 }
 0x5f3   : > { %v705_v63 = vpop.permute.xlu0 %704 }
 0x5f4   : > { %708 = vst.msk [vmem:[#allocation2] sm:$0xff] %vm707_vm6, %v705_v63 }
 0x61a   : > { %v821_v1 = vpop.permute.xlu1 %820 }
 0x61b   : > { %824 = vst.msk [vmem:[#allocation2] sm:$0xff] %vm823_vm7, %v821_v1 }
 0x622   : > { %v937_v2 = vpop.permute.xlu0 %936 }
 0x623   : > { %940 = vst.msk [vmem:[#allocation2] sm:$0xff] %vm939_vm8, %v937_v2 }
 0x62a   : > { %v941_v3 = vld [vmem:[#allocation2] sm:$0xff] }
 0x62b   : > { %v942_v4 = vpack.c.bf16 %v941_v3, %v941_v3 }
 0x62d   : > { %1422 = vmatmul.mubr.msk.bf16.vlgmr.msra.gmra.mxu1 %vm386_vm0, %v942_v4 }
 0x62e   : > { %1441 = vmatprep.mubr.msk.bf16.mxu1 %vm1669_vm1, %v1668_v8 }
 0x6ed   : > { %v1003_v6 = vpop.f32.mrf.mxu1 }
 0x6ee   : > { %v1004_v7 = vadd.f32 %v1311_v5, %v1003_v6 }
 0x6ef   : > { %v1423_v9 = vpop.f32.mrf.mxu1 }
 0x6f0   : > { %v1932_v10 = vadd.f32 %v1004_v7, %v1828_v0  ;;  %v1529_v0 = vld [vmem:[%s2017_s8 + $0x18] sm:$0xff]  }
 0x6f1   : > { %v1006_v11 = vpop.f32.mrf.mxu1  ;;  %1434 = vmatpush3.bf16.msra.mxu1 %v1529_v0 }
 0x6f2   : > { %v1012_v12 = vsel %vm386_vm0, %v1932_v10, 0.0  ;;  %1435 = vmatprep.subr.bf16.mxu1 %v1668_v8 }
 0x6f3   : > { %1013 = vadd.xlane.f32.xlu1 %v1012_v12  ;;  %v1424_v13 = vpop.f32.mrf.mxu1 }
 0x6f5   : > { %1436 = vmatpush3.bf16.msra.mxu1 %v1530_v21 }
 0x6f6   : > { %1437 = vmatprep.subr.bf16.mxu1 %v1668_v8 }
 0x6f9   : > { %1438 = vmatpush3.bf16.msra.mxu1 %v1531_v37 }
 0x6fa   : > { %1439 = vmatprep.subr.bf16.mxu1 %v1668_v8  ;;  %v1317_v8 = vld [vmem:[%s2018_s9] ss:$0 sm:$0xff] }
 0x6fb   : > { %v1044_v47 = vadd.f32 %v1317_v8, %v1932_v10 }
 0x6fd   : > { %1440 = vmatpush3.bf16.msra.mxu1 %v1532_v38 }
 0x77c   : > { %v1014_v14 = vpop.xlane.xlu1 %1013 }
 0x77d   : > { %v1015_v15 = vmul.f32 0.03125, %v1014_v14 }
 0x77f   : > { %v1016_v16 = vsub.f32 %v1932_v10, %v1015_v15 }
 0x781   : > { %v1017_v17 = vmul.f32 %v1016_v16, %v1016_v16  ;;  %v1032_v31 = vmul.f32 %v1031_v30, %v1016_v16 }
 0x783   : > { %v1018_v18 = vsel %vm386_vm0, %v1017_v17, 0.0 }
 0x784   : > { %1019 = vadd.xlane.f32.xlu0 %v1018_v18 }
 0x80d   : > { %v1020_v22 = vpop.xlane.xlu0 %1019 }
 0x80e   : > { %v1021_v23 = vmul.f32 0.032258064, %v1020_v22 }
 0x810   : > { %1553 = vrsqrt.f32 %v1021_v23  ;;  %vm1024_vm9 = vcmp.eq.f32.partialorder %v1021_v23, inf  ;;  %v1027_v26 = vand.u32 2147483648, %v1021_v23  ;;  %vm1026_vm10 = vcmp.eq.f32.partialorder %v1021_v23, 0.0 }
 0x81d   : > { %v1554_v24 = vpop.eup %1553 }
 0x81e   : > { %v1023_v25 = vmul.f32 %v1554_v24, %v1021_v23 }
 0x820   : > { %v1025_v27 = vsel %vm1024_vm9, %v1021_v23, %v1023_v25 }
 0x821   : > { %v1028_v28 = vsel %vm1026_vm10, %v1027_v26, %v1025_v27 }
 0x822   : > { %v1029_v29 = vadd.f32 1e-06, %v1028_v28 }
 0x824   : > { %1555 = vrcp.f32 %v1029_v29 }
 0x831   : > { %v1556_v32 = vpop.eup %1555 }
 0x832   : > { %v1033_v34 = vmul.f32 %v1556_v32, %v1032_v31 }
 0x834   : > { %v1035_v35 = vadd.f32 %v1034_v33, %v1033_v34 }
 0x836   : > { %v1036_v36 = vpack.c.bf16 %v1035_v35, %v1035_v35 }
 0x838   : > { %1430 = vmatmul.mubr.msk.bf16.vlgmr.msra.gmra.mxu0 %vm386_vm0, %v1036_v36 }
 0x8f8   : > { %v1105_v40 = vpop.f32.mrf.mxu0 }
 0x8f9   : > { %v1106_v41 = vadd.f32 %v1318_v39, %v1105_v40 }
 0x8fa   : > { %v1431_v42 = vpop.f32.mrf.mxu0 }
 0x8fb   : > { %v1111_v43 = vmax.f32 %v1106_v41, 0.0 }
 0x8fc   : > { %v1108_v44 = vpop.f32.mrf.mxu0 }
 0x8fd   : > { %v1112_v45 = vpack.c.bf16 %v1111_v43, %v1111_v43 }
 0x8fe   : > { %v1432_v46 = vpop.f32.mrf.mxu0 }
 0x8ff   : > { %1442 = vmatmul.mubr.msk.bf16.vlgmr.msra.gmra.mxu1 %vm1145_vm11, %v1112_v45 }
 0x9bf   : > { %v1183_v48 = vpop.f32.mrf.mxu1 }
 0x9c0   : > { %v1189_v49 = vadd.f32 %v1183_v48, %v1044_v47 }
 0x9c1   : > { %v1443_v50 = vpop.f32.mrf.mxu1 }
 0x9c2   : > { %1190 = vst.msk [vmem:[%s377_s12] sm:$0xff] %vm386_vm0, %v1189_v49 }
 0x9c3   : > { %v1186_v51 = vpop.f32.mrf.mxu1 }
 0x9c4   : > { %1607 = shalt.err (!%p1604_p2)
}
 0x9c5   : > { %s1608_s11 = scalar_lea.hbm %s1967_s26, 128  ;;  %s1612_s20 = scalar_lea.hbm %s2019_s10, 256 }
 0x9c6   : > { %p1609_p3 = scmp.ne.s32.totalorder %s1967_s26, %s1608_s11  ;;  %p1613_p8 = scmp.lt.s32.totalorder %s1967_s26, %s2019_s10 }
 0x9c7   : > { %p1614_p11 = scmp.lt.s32.totalorder %s1612_s20, %s1608_s11 }
 0x9c8   : > { %p1610_p4 = pnand %p1609_p3, %p1778_p5 }
 0x9c9   : > { %p1615_p9 = por %p1614_p11, %p1613_p8 }
 0x9ca   : > { %p1611_p7 = pneg %p1610_p4 }
 0x9cc   : > { %p1616_p10 = pnand %p1615_p9, %p1611_p7 }
 0x9ce   : > { %1619 = shalt.err (!%p1616_p10)
}
 0x9cf   : > { %1453 = dma.vmem_to_hbm [thread:$0]  (%p1778_p5), %s1969_s18, 128, %s1967_s26, %s1192_s17   ;;  %v1444_v52 = vpop.f32.mrf.mxu1 }
 0x9d0 PF: > { %p1470_p12 = scmp.ge.s32.totalorder %s1662_s16, 2  ;;  %s1217_s27 = sand.u32 1, %s1650_s13  }
 0x9d1   : > { %s1218_s29 = scalar_lea.sflag [#allocation5], %s1217_s27 }
 0x9d2   : > { %p1463_p13 = pnand %p1470_p12, %p1782_p6 }
 0x9d4   : > { %p1464_p0 = pneg %p1463_p13 }
 0x9d6   : > { %1645 = dma.done.wait (%p1464_p0), %s1218_s29, 128  }
 0x9d7   : > { %1647 = vsyncadd (%p1464_p0), %s1218_s29, 4294967168  ;;  %p22_p1 = scmp.ge.s32.totalorder %s1765_s19, 4   ;;  %s2024_s13 = smov %s1654_s14 }
 0x9d8   : > { %s2025_s14 = smov %s1658_s15  ;;  %s2026_s15 = smov %s1776_s22 }
 0x9d9   : > { %s2027_s16 = smov %s1765_s19  ;;  %24 = sbr.rel (!%p22_p1) target bundleno = 5 (0x5), region = 105 }
 0x9de   :  { %1223 = vsyncpa [#allocation4], 1 }
 0x9df   :  { %1225 = vsyncpa [#allocation4 + $0x1], 1 }
 0x9e0   :  { %1226 = vsyncpa [#allocation5], 1 }
 0x9e1   :  { %1228 = vsyncpa [#allocation5 + $0x1], 1 }
 0x9e2   :  { %1229 = vsyncpa [#allocation6], 1 }
 0x9e3   :  { %1231 = vsyncpa [#allocation6 + $0x1], 1 }

</bundles_post_ra>
